<compile_context>
chip_gen: v7x
topology: tpu7x:2x2x1
jax: 0.10.0
libtpu: 0.0.40
codegen_flags: <defaults>
</compile_context>

<pallas_src>
import functools

import jax
import jax.numpy as jnp
import numpy as np
from jax.experimental import pallas as pl
from jax.experimental.pallas import tpu as pltpu

_LANE = 128
_TILE_B_MAX = 256    # multiple of 256: fills the 256-wide MXU M-dim on v6e/v7x
_TILE_E_MAX = 2048   # lane-axis tile; keeps double-buffered VMEM use ~5 MiB


def _round_up(x, m):
    return ((x + m - 1) // m) * m


def _generator_kernel(xc_ref, w1_ref, b1_ref, w2_ref, b2_ref,
                      wdiff_ref, bdiff_ref, gd_ref, edges_ref, h2_ref):
    # fc1 + relu and fc2 + relu only at the first E tile of each batch tile;
    # h2 (bf16 MXU operand) is carried across the E axis in VMEM scratch.
    @pl.when(pl.program_id(1) == 0)
    def _():
        h1 = (jnp.dot(xc_ref[...], w1_ref[...],
                      preferred_element_type=jnp.float32) + b1_ref[...])
        h1 = jnp.maximum(h1, 0.0).astype(jnp.bfloat16)
        h2 = (jnp.dot(h1, w2_ref[...],
                      preferred_element_type=jnp.float32) + b2_ref[...])
        h2_ref[...] = jnp.maximum(h2, 0.0).astype(jnp.bfloat16)

    # fused fc3 difference channel + gumbel difference (f32 elementwise):
    #   d = (logit0 + g0) - (logit1 + g1)
    d = (jnp.dot(h2_ref[...], wdiff_ref[...],
                 preferred_element_type=jnp.float32)
         + bdiff_ref[...] + gd_ref[...].astype(jnp.float32))
    # hard gumbel-softmax channel 0 == indicator of argmax over the size-2 axis
    edges_ref[...] = (d >= 0.0).astype(jnp.bfloat16)


@functools.partial(jax.jit, static_argnames=("output_dim",))
def generator_forward(x, cond, params, gumbel, output_dim):
    """Generator forward pass.

    x:      (B, noise_dim) f32
    cond:   (B, cond_dim)  f32
    params: dict with w1,b1,w2,b2,w3,b3 in torch layout (weight = (out, in))
    gumbel: (B, E, 2) f32 gumbel noise (sampled outside, deterministic)
    """
    N = output_dim
    E = N * (N - 1) // 2
    B, nd = x.shape
    cd = cond.shape[1]
    H1 = params["w1"].shape[0]
    H2 = params["w2"].shape[0]
    K = nd + cd

    # ---- parameter prep (tiny, B-independent) -------------------------------
    w1 = params["w1"].T.astype(jnp.bfloat16)                    # (K, H1)
    w2 = params["w2"].T.astype(jnp.bfloat16)                    # (H1, H2)
    w3 = params["w3"].T.astype(jnp.float32)                     # (H2, 2E); col 2e+c = (e, c)
    wdiff = (w3[:, 0::2] - w3[:, 1::2]).astype(jnp.bfloat16)    # (H2, E)
    b1 = params["b1"].astype(jnp.float32)[None, :]
    b2 = params["b2"].astype(jnp.float32)[None, :]
    bdiff = (params["b3"][0::2] - params["b3"][1::2]).astype(jnp.float32)[None, :]
    # Gumbel difference (the only B*E-sized kernel input), shipped as bf16.
    # TODO(synk): optionally sample this logistic noise in-kernel with
    # pltpu.prng_seed/prng_random_bits to drop the stream entirely; kept
    # host-side for deterministic parity with the reference.
    gd = (gumbel[:, :, 0] - gumbel[:, :, 1]).astype(jnp.bfloat16)

    # ---- tiling: big sublane-aligned batch tiles, lane-dense E tiles ---------
    tile_b = min(_TILE_B_MAX, _round_up(B, 16))
    tile_e = min(_TILE_E_MAX, _round_up(E, _LANE))
    B_pad = _round_up(B, tile_b)
    E_pad = _round_up(E, tile_e)

    def pad2(a, rows, cols, val=0.0):
        return jnp.pad(a, ((0, rows - a.shape[0]), (0, cols - a.shape[1])),
                       constant_values=val)

    xc = pad2(jnp.concatenate([x, cond], axis=1).astype(jnp.bfloat16), B_pad, K)
    gd_p = pad2(gd, B_pad, E_pad, val=-1e4)   # padded lanes decide to 0 (and are sliced off)
    wdiff_p = pad2(wdiff, H2, E_pad)
    bdiff_p = pad2(bdiff, 1, E_pad)

    grid = (B_pad // tile_b, E_pad // tile_e)

    # ---- explicit VMEM budget (double-buffered streams + scratch) ------------
    per_buf = (tile_b * K * 2 + K * H1 * 2 + H1 * 4 + H1 * H2 * 2 + H2 * 4
               + H2 * tile_e * 2 + tile_e * 4
               + tile_b * tile_e * 2        # gd in
               + tile_b * tile_e * 2)       # edges out
    vmem_bytes = 2 * per_buf + tile_b * H2 * 2
    # Tiles are capped so this stays far below v7x's 64 MiB physical VMEM.
    vmem_limit = int(min(60 * 1024 * 1024,
                         max(2 * vmem_bytes, 32 * 1024 * 1024)))

    const = lambda b, e: (0, 0)   # weights stay VMEM-resident across the grid

    edges = pl.pallas_call(
        _generator_kernel,
        out_shape=jax.ShapeDtypeStruct((B_pad, E_pad), jnp.bfloat16),
        grid_spec=pltpu.PrefetchScalarGridSpec(
            num_scalar_prefetch=0,
            grid=grid,
            in_specs=[
                pl.BlockSpec((tile_b, K), lambda b, e: (b, 0)),        # x||cond (bf16)
                pl.BlockSpec((K, H1), const),                          # w1 (bf16)
                pl.BlockSpec((1, H1), const),                          # b1 (f32)
                pl.BlockSpec((H1, H2), const),                         # w2 (bf16)
                pl.BlockSpec((1, H2), const),                          # b2 (f32)
                pl.BlockSpec((H2, tile_e), lambda b, e: (0, e)),       # wdiff (bf16)
                pl.BlockSpec((1, tile_e), lambda b, e: (0, e)),        # bdiff (f32)
                pl.BlockSpec((tile_b, tile_e), lambda b, e: (b, e)),   # gumbel diff (bf16)
            ],
            out_specs=pl.BlockSpec((tile_b, tile_e), lambda b, e: (b, e)),
            scratch_shapes=[pltpu.VMEM((tile_b, H2), jnp.bfloat16)],   # h2 carry
        ),
        compiler_params=pltpu.CompilerParams(
            dimension_semantics=("parallel", "arbitrary"),  # batch sharded on v7x's 2 TCs
            vmem_limit_bytes=vmem_limit,
        ),
    )(xc, w1, b1, w2, b2, wdiff_p, bdiff_p, gd_p)

    # bf16 {0,1} -> exact f32 {0.0, 1.0}
    edges = edges[:B, :E].astype(jnp.float32)

    # Symmetric scatter into the adjacency: indices built with numpy at trace
    # time (compile-time constants); avoids any O(N^4)-byte scatter matrix.
    iu0, iu1 = np.triu_indices(N, k=1)
    adj = jnp.zeros((B, N, N), jnp.float32)
    adj = adj.at[:, iu0, iu1].set(edges)
    return adj + jnp.swapaxes(adj, 1, 2)


def _reference_forward(x, cond, params, gumbel, output_dim):
    """Pure-JAX f32 reference mirroring the PyTorch forward; also returns the
    per-edge decision margin (y0 - y1) for the mixed-precision check."""
    N = output_dim
    B = x.shape[0]
    h = jnp.concatenate([x, cond], axis=1)
    h = jax.nn.relu(h @ params["w1"].T + params["b1"])
    h = jax.nn.relu(h @ params["w2"].T + params["b2"])
    logits = (h @ params["w3"].T + params["b3"]).reshape(B, -1, 2)
    y = logits + gumbel
    hard = (jnp.argmax(y, axis=-1) == 0).astype(jnp.float32)
    margin = y[:, :, 0] - y[:, :, 1]
    iu0, iu1 = np.triu_indices(N, k=1)
    adj = jnp.zeros((B, N, N), jnp.float32)
    adj = adj.at[:, iu0, iu1].set(hard)
    return adj + jnp.transpose(adj, (0, 2, 1)), margin


def _init_linear(key, out_dim, in_dim):
    # Matches torch.nn.Linear default: U(-1/sqrt(fan_in), 1/sqrt(fan_in))
    kw, kb = jax.random.split(key)
    bound = 1.0 / np.sqrt(in_dim)
    w = jax.random.uniform(kw, (out_dim, in_dim), jnp.float32, -bound, bound)
    b = jax.random.uniform(kb, (out_dim,), jnp.float32, -bound, bound)
    return w, b


if __name__ == "__main__":
    noise_dim, cond_dim = 8, 4
    hidden_dim, hidden_dim2 = 32, 32
    output_dim = 8
    B = 2
    E = output_dim * (output_dim - 1) // 2

    key = jax.random.PRNGKey(0)
    k1, k2, k3, kx, kc, kg = jax.random.split(key, 6)

    w1, b1 = _init_linear(k1, hidden_dim, noise_dim + cond_dim)
    w2, b2 = _init_linear(k2, hidden_dim2, hidden_dim)
    w3, b3 = _init_linear(k3, 2 * E, hidden_dim2)
    params = {"w1": w1, "b1": b1, "w2": w2, "b2": b2, "w3": w3, "b3": b3}

    x = jax.random.normal(kx, (B, noise_dim), jnp.float32)
    cond = jax.random.normal(kc, (B, cond_dim), jnp.float32)
    # Gumbel noise as in torch.nn.functional.gumbel_softmax: g = -log(Exp(1))
    gumbel = -jnp.log(jax.random.exponential(kg, (B, E, 2), jnp.float32))

    adj = generator_forward(x, cond, params, gumbel, output_dim)
    adj = jax.block_until_ready(adj)

    ref, margin = _reference_forward(x, cond, params, gumbel, output_dim)
    adj_np = np.asarray(adj)
    ref_np = np.asarray(ref)
    m = np.abs(np.asarray(margin))                       # (B, E) f32 decision margin

    # Hard-threshold output computed with bf16 matmul/noise inputs: decisions
    # must match the f32 reference wherever the margin comfortably exceeds the
    # bf16 rounding error; exact FP ties may flip (noted in the perf review).
    iu0, iu1 = np.triu_indices(output_dim, k=1)
    kern_edges = adj_np[:, iu0, iu1]
    ref_edges = ref_np[:, iu0, iu1]
    safe = m > 1e-1
    np.testing.assert_allclose(kern_edges[safe], ref_edges[safe])
    # Structural invariants always hold.
    np.testing.assert_allclose(adj_np, np.swapaxes(adj_np, 1, 2))
    assert np.all(np.isin(adj_np, [0.0, 1.0]))
    assert np.all(np.diagonal(adj_np, axis1=1, axis2=2) == 0.0)
    assert adj.shape == (B, output_dim, output_dim)

    print("KERNEL_OK")
</pallas_src>

<mosaic_0001>
module attributes {stable_mosaic.version = 11 : i64} {
  func.func @_generator_kernel(%arg0: i32, %arg1: i32, %arg2: memref<16x12xbf16, #tpu.memory_space<vmem>>, %arg3: memref<12x32xbf16, #tpu.memory_space<vmem>>, %arg4: memref<1x32xf32, #tpu.memory_space<vmem>>, %arg5: memref<32x32xbf16, #tpu.memory_space<vmem>>, %arg6: memref<1x32xf32, #tpu.memory_space<vmem>>, %arg7: memref<32x128xbf16, #tpu.memory_space<vmem>>, %arg8: memref<1x128xf32, #tpu.memory_space<vmem>>, %arg9: memref<16x128xbf16, #tpu.memory_space<vmem>>, %arg10: memref<16x128xbf16, #tpu.memory_space<vmem>>, %arg11: memref<16x32xbf16, #tpu.memory_space<vmem>>) attributes {dimension_semantics = [#tpu.dimension_semantics<parallel>, #tpu.dimension_semantics<arbitrary>], iteration_bounds = array<i64: 1, 1>, scalar_prefetch = 0 : i64, scratch_operands = 1 : i64, tpu.core_type = #tpu.core_type<tc>, window_params = [{transform_indices = @transform_0, window_bounds = array<i64: 16, 12>}, {pipeline_mode = #tpu.pipeline_mode<synchronous>, transform_indices = @transform_1, window_bounds = array<i64: 12, 32>}, {pipeline_mode = #tpu.pipeline_mode<synchronous>, transform_indices = @transform_2, window_bounds = array<i64: 1, 32>}, {pipeline_mode = #tpu.pipeline_mode<synchronous>, transform_indices = @transform_3, window_bounds = array<i64: 32, 32>}, {pipeline_mode = #tpu.pipeline_mode<synchronous>, transform_indices = @transform_4, window_bounds = array<i64: 1, 32>}, {transform_indices = @transform_5, window_bounds = array<i64: 32, 128>}, {transform_indices = @transform_6, window_bounds = array<i64: 1, 128>}, {transform_indices = @transform_7, window_bounds = array<i64: 16, 128>}, {transform_indices = @transform_8, window_bounds = array<i64: 16, 128>}]} {
    %c0_i32 = arith.constant 0 : i32
    %0 = arith.cmpi eq, %arg1, %c0_i32 : i32
    %1 = arith.extui %0 : i1 to i32
    %c0_i32_0 = arith.constant 0 : i32
    %2 = arith.cmpi ne, %1, %c0_i32_0 : i32
    scf.if %2 {
      %c0_11 = arith.constant 0 : index
      %c0_12 = arith.constant 0 : index
      %18 = vector.load %arg2[%c0_11, %c0_12] : memref<16x12xbf16, #tpu.memory_space<vmem>>, vector<16x12xbf16>
      %c0_13 = arith.constant 0 : index
      %c0_14 = arith.constant 0 : index
      %19 = vector.load %arg3[%c0_13, %c0_14] : memref<12x32xbf16, #tpu.memory_space<vmem>>, vector<12x32xbf16>
      %cst_15 = arith.constant dense<0.000000e+00> : vector<16x32xf32>
      %20 = tpu.matmul %18, %19, %cst_15 {dimension_numbers = #tpu.dot_dimension_numbers<[1], [0], [0], [1], [0, 0, 1, 1], [], []>} : vector<16x12xbf16>, vector<12x32xbf16>, vector<16x32xf32> -> vector<16x32xf32>
      %c0_16 = arith.constant 0 : index
      %c0_17 = arith.constant 0 : index
      %21 = vector.load %arg4[%c0_16, %c0_17] : memref<1x32xf32, #tpu.memory_space<vmem>>, vector<1x32xf32>
      %22 = vector.broadcast %21 : vector<1x32xf32> to vector<16x32xf32>
      %23 = arith.addf %20, %22 : vector<16x32xf32>
      %cst_18 = arith.constant 0.000000e+00 : f32
      %24 = vector.broadcast %cst_18 : f32 to vector<16x32xf32>
      %25 = arith.maximumf %23, %24 : vector<16x32xf32>
      %26 = arith.truncf %25 : vector<16x32xf32> to vector<16x32xbf16>
      %c0_19 = arith.constant 0 : index
      %c0_20 = arith.constant 0 : index
      %27 = vector.load %arg5[%c0_19, %c0_20] : memref<32x32xbf16, #tpu.memory_space<vmem>>, vector<32x32xbf16>
      %cst_21 = arith.constant dense<0.000000e+00> : vector<16x32xf32>
      %28 = tpu.matmul %26, %27, %cst_21 {dimension_numbers = #tpu.dot_dimension_numbers<[1], [0], [0], [1], [0, 0, 1, 1], [], []>} : vector<16x32xbf16>, vector<32x32xbf16>, vector<16x32xf32> -> vector<16x32xf32>
      %c0_22 = arith.constant 0 : index
      %c0_23 = arith.constant 0 : index
      %29 = vector.load %arg6[%c0_22, %c0_23] : memref<1x32xf32, #tpu.memory_space<vmem>>, vector<1x32xf32>
      %30 = vector.broadcast %29 : vector<1x32xf32> to vector<16x32xf32>
      %31 = arith.addf %28, %30 : vector<16x32xf32>
      %cst_24 = arith.constant 0.000000e+00 : f32
      %32 = vector.broadcast %cst_24 : f32 to vector<16x32xf32>
      %33 = arith.maximumf %31, %32 : vector<16x32xf32>
      %34 = arith.truncf %33 : vector<16x32xf32> to vector<16x32xbf16>
      %c0_25 = arith.constant 0 : index
      %c0_26 = arith.constant 0 : index
      %35 = vector.load %arg11[%c0_25, %c0_26] : memref<16x32xbf16, #tpu.memory_space<vmem>>, vector<16x32xbf16>
      tpu.vector_store %arg11[%c0_25, %c0_26], %34 {strides = array<i32>} : memref<16x32xbf16, #tpu.memory_space<vmem>>, vector<16x32xbf16>,
    } else {
    }
    %c0 = arith.constant 0 : index
    %c0_1 = arith.constant 0 : index
    %3 = vector.load %arg11[%c0, %c0_1] : memref<16x32xbf16, #tpu.memory_space<vmem>>, vector<16x32xbf16>
    %c0_2 = arith.constant 0 : index
    %c0_3 = arith.constant 0 : index
    %4 = vector.load %arg7[%c0_2, %c0_3] : memref<32x128xbf16, #tpu.memory_space<vmem>>, vector<32x128xbf16>
    %cst = arith.constant dense<0.000000e+00> : vector<16x128xf32>
    %5 = tpu.matmul %3, %4, %cst {dimension_numbers = #tpu.dot_dimension_numbers<[1], [0], [0], [1], [0, 0, 1, 1], [], []>} : vector<16x32xbf16>, vector<32x128xbf16>, vector<16x128xf32> -> vector<16x128xf32>
    %c0_4 = arith.constant 0 : index
    %c0_5 = arith.constant 0 : index
    %6 = vector.load %arg8[%c0_4, %c0_5] : memref<1x128xf32, #tpu.memory_space<vmem>>, vector<1x128xf32>
    %7 = vector.broadcast %6 : vector<1x128xf32> to vector<16x128xf32>
    %8 = arith.addf %5, %7 : vector<16x128xf32>
    %c0_6 = arith.constant 0 : index
    %c0_7 = arith.constant 0 : index
    %9 = vector.load %arg9[%c0_6, %c0_7] : memref<16x128xbf16, #tpu.memory_space<vmem>>, vector<16x128xbf16>
    %10 = arith.extf %9 : vector<16x128xbf16> to vector<16x128xf32>
    %11 = arith.addf %8, %10 : vector<16x128xf32>
    %cst_8 = arith.constant 0.000000e+00 : f32
    %12 = vector.broadcast %cst_8 : f32 to vector<16x128xf32>
    %13 = arith.cmpf oge, %11, %12 : vector<16x128xf32>
    %14 = arith.extui %13 : vector<16x128xi1> to vector<16x128xi32>
    %15 = arith.sitofp %14 : vector<16x128xi32> to vector<16x128xf32>
    %16 = arith.truncf %15 : vector<16x128xf32> to vector<16x128xbf16>
    %c0_9 = arith.constant 0 : index
    %c0_10 = arith.constant 0 : index
    %17 = vector.load %arg10[%c0_9, %c0_10] : memref<16x128xbf16, #tpu.memory_space<vmem>>, vector<16x128xbf16>
    tpu.vector_store %arg10[%c0_9, %c0_10], %16 {strides = array<i32>} : memref<16x128xbf16, #tpu.memory_space<vmem>>, vector<16x128xbf16>,
    return
  }
  func.func @transform_0(%arg0: i32, %arg1: i32) -> (i32, i32) {
    %c0_i32 = arith.constant 0 : i32
    %c0_i32_0 = arith.constant 0 : i32
    return %arg0, %c0_i32 : i32, i32
  }
  func.func @transform_1(%arg0: i32, %arg1: i32) -> (i32, i32) {
    %c0_i32 = arith.constant 0 : i32
    %c0_i32_0 = arith.constant 0 : i32
    %c0_i32_1 = arith.constant 0 : i32
    return %c0_i32, %c0_i32_0 : i32, i32
  }
  func.func @transform_2(%arg0: i32, %arg1: i32) -> (i32, i32) {
    %c0_i32 = arith.constant 0 : i32
    %c0_i32_0 = arith.constant 0 : i32
    %c0_i32_1 = arith.constant 0 : i32
    return %c0_i32, %c0_i32_0 : i32, i32
  }
  func.func @transform_3(%arg0: i32, %arg1: i32) -> (i32, i32) {
    %c0_i32 = arith.constant 0 : i32
    %c0_i32_0 = arith.constant 0 : i32
    %c0_i32_1 = arith.constant 0 : i32
    return %c0_i32, %c0_i32_0 : i32, i32
  }
  func.func @transform_4(%arg0: i32, %arg1: i32) -> (i32, i32) {
    %c0_i32 = arith.constant 0 : i32
    %c0_i32_0 = arith.constant 0 : i32
    %c0_i32_1 = arith.constant 0 : i32
    return %c0_i32, %c0_i32_0 : i32, i32
  }
  func.func @transform_5(%arg0: i32, %arg1: i32) -> (i32, i32) {
    %c0_i32 = arith.constant 0 : i32
    %c0_i32_0 = arith.constant 0 : i32
    return %c0_i32, %arg1 : i32, i32
  }
  func.func @transform_6(%arg0: i32, %arg1: i32) -> (i32, i32) {
    %c0_i32 = arith.constant 0 : i32
    %c0_i32_0 = arith.constant 0 : i32
    return %c0_i32, %arg1 : i32, i32
  }
  func.func @transform_7(%arg0: i32, %arg1: i32) -> (i32, i32) {
    %c0_i32 = arith.constant 0 : i32
    return %arg0, %arg1 : i32, i32
  }
  func.func @transform_8(%arg0: i32, %arg1: i32) -> (i32, i32) {
    %c0_i32 = arith.constant 0 : i32
    return %arg0, %arg1 : i32, i32
  }
}

</mosaic_0001>

<bundles_post_ra>
// kernel: generator_forward.1
= control target key start
LH: loop header
LB: loop body
LE: loop exit
PB: predicated region body
PF: predicated region fallthrough
CT: control target
= control target key end

     0   :  { %vm59_vm0 = vcmask 1045504   ;;  %v337_v0 = vmov 0.0   ;;  %vm338_vm1 = vmmov 0   ;;  %vm55_vm2 = vcmask 97280   ;;  %s430_s1 = inlined_call_operand.vmem [shape: bf16[12,32], index: 1, kind: input, shape index: {}]   ;;  %s431_s0 = inlined_call_operand.vmem [shape: bf16[16,12], index: 0, kind: input, shape index: {}]   ;;  %s432_s3 = inlined_call_operand.vmem [shape: bf16[32,32], index: 3, kind: input, shape index: {}]   ;;  %s433_s2 = inlined_call_operand.vmem [shape: f32[1,32], index: 2, kind: input, shape index: {}]   ;;  %s434_s5 = inlined_call_operand.vmem [shape: bf16[32,128], index: 5, kind: input, shape index: {}]   ;;  %s435_s4 = inlined_call_operand.vmem [shape: f32[1,32], index: 4, kind: input, shape index: {}]   ;;  %s436_s7 = inlined_call_operand.vmem [shape: bf16[16,128], index: 7, kind: input, shape index: {}]   ;;  %s437_s6 = inlined_call_operand.vmem [shape: f32[1,128], index: 6, kind: input, shape index: {}]   ;;  %s438_s8 = inlined_call_operand.vmem [shape: bf16[16,128], index: 8, kind: output, shape index: {}]  }
   0x1   :  { %307 = vmatprep.subr.bf16.mxu0 %v337_v0  ;;  %v331_v1 = vld [vmem:[%s430_s1] sm:$0x3f]   ;;  %309 = vmatprep.mubr.msk.bf16.mxu0 %vm338_vm1, %v337_v0  ;;  %v334_v5 = vld [vmem:[%s432_s3 + $0x8] sm:$0xff]   ;;  %vm130_vm3 = vcmask 261120  }
   0x2   :  { %313 = vmatprep.subr.bf16.mxu1 %v337_v0  ;;  %317 = vmatprep.mubr.msk.bf16.mxu1 %vm338_vm1, %v337_v0  ;;  %v61_v2 = vsel %vm59_vm0, %v331_v1, 0  ;;  %v332_v3 = vld [vmem:[%s431_s0] sm:$0xff]   ;;  %v336_v17 = vld [vmem:[%s434_s5 + $0x8] sm:$0xff]  }
   0x3   :  { %308 = vmatpush3.bf16.msra.mxu0 %v61_v2  ;;  %v333_v4 = vld [vmem:[%s432_s3] sm:$0xff]  }
   0x4   :  { %321 = vmatprep.subr.bf16.mxu0 %v337_v0  ;;  %314 = vmatpush3.bf16.msra.mxu1 %v333_v4  ;;  %v274_v6 = vld [vmem:[%s433_s2] ss:$0 sm:$0xff] }
   0x5   :  { %315 = vmatprep.subr.bf16.mxu1 %v337_v0  ;;  %v335_v16 = vld [vmem:[%s434_s5] sm:$0xff]  }
   0x6   :  { %310 = vmatmul.mubr.msk.bf16.vlgmr.msra.gmra.mrb[0].mxu0 %vm55_vm2, %v332_v3  ;;  %v278_v18 = vld [vmem:[%s435_s4] ss:$0 sm:$0xff] }
   0x7   :  { %325 = vmatprep.mubr.msk.bf16.mxu0 %vm338_vm1, %v337_v0  ;;  %322 = vmatpush3.bf16.msra.mxu0 %v335_v16  ;;  %v293_v29 = vld [vmem:[%s436_s7] sm:$0xff]  }
   0x8   :  { %316 = vmatpush3.bf16.msra.mxu1 %v334_v5  ;;  %323 = vmatprep.subr.bf16.mxu0 %v337_v0  ;;  %v282_v30 = vld [vmem:[%s437_s6] ss:$0 sm:$0xff]  ;;  %v294_v31 = vunpack.c.l.bf16 %v293_v29  ;;  %v295_v35 = vunpack.c.h.bf16 %v293_v29 }
   0xb   :  { %324 = vmatpush3.bf16.msra.mxu0 %v336_v17 }
  0xd9   :  { %v97_v7 = vpop.f32.mrb[0].mxu0 }
  0xda   :  { %v98_v8 = vadd.f32 %v274_v6, %v97_v7  ;;  %v311_v9 = vpop.f32.mrb[1].mxu0 }
  0xdb   :  { %v100_v10 = vpop.f32.mrb[2].mxu0 }
  0xdc   :  { %v101_v11 = vadd.f32 %v274_v6, %v100_v10  ;;  %v312_v12 = vpop.f32.mrb[3].mxu0  ;;  %v104_v13 = vmax.f32 %v98_v8, 0.0 }
  0xde   :  { %v105_v14 = vmax.f32 %v101_v11, 0.0 }
  0xe0   :  { %v106_v15 = vpack.c.bf16 %v105_v14, %v104_v13 }
  0xe2   :  { %318 = vmatmul.mubr.msk.bf16.vlgmr.msra.gmra.mrb[0].mxu1 %vm130_vm3, %v106_v15 }
 0x1b5   :  { %v168_v19 = vpop.f32.mrb[0].mxu1 }
 0x1b6   :  { %v169_v20 = vadd.f32 %v278_v18, %v168_v19  ;;  %v319_v21 = vpop.f32.mrb[1].mxu1 }
 0x1b7   :  { %v171_v22 = vpop.f32.mrb[2].mxu1 }
 0x1b8   :  { %v172_v23 = vadd.f32 %v278_v18, %v171_v22  ;;  %v320_v24 = vpop.f32.mrb[3].mxu1  ;;  %v175_v25 = vmax.f32 %v169_v20, 0.0 }
 0x1ba   :  { %v176_v26 = vmax.f32 %v172_v23, 0.0 }
 0x1bc   :  { %v177_v27 = vpack.c.bf16 %v176_v26, %v175_v25 }
 0x1be   :  { %178 = vst.msk [vmem:[#allocation2] sm:$0xff] %vm130_vm3, %v177_v27 }
 0x1c5   :  { %v179_v28 = vld [vmem:[#allocation2] sm:$0xff] }
 0x1c6   :  { %326 = vmatmul.mubr.msk.bf16.vlgmr.msra.gmra.mrb[4].mxu0 %vm130_vm3, %v179_v28 }
 0x299   :  { %v241_v32 = vpop.f32.mrb[4].mxu0 }
 0x29a   :  { %v242_v33 = vadd.f32 %v282_v30, %v241_v32  ;;  %v327_v34 = vpop.f32.mrb[5].mxu0 }
 0x29b   :  { %v244_v36 = vpop.f32.mrb[6].mxu0 }
 0x29c   :  { %v252_v37 = vadd.f32 %v294_v31, %v242_v33  ;;  %v245_v38 = vadd.f32 %v282_v30, %v244_v36  ;;  %v328_v39 = vpop.f32.mrb[7].mxu0 }
 0x29e   :  { %vm254_vm4 = vcmp.ge.f32.partialorder %v252_v37, 0.0  ;;  %v253_v40 = vadd.f32 %v295_v35, %v245_v38 }
 0x29f   :  { %v286_v41 = vsel %vm254_vm4, 1.0, %v337_v0 }
 0x2a0   :  { %vm255_vm5 = vcmp.ge.f32.partialorder %v253_v40, 0.0 }
 0x2a1   :  { %v287_v42 = vsel %vm255_vm5, 1.0, %v337_v0 }
 0x2a2   :  { %v297_v43 = vpack.c.bf16 %v287_v42, %v286_v41 }
 0x2a4   :  { %298 = vst [vmem:[%s438_s8] sm:$0xff] %v297_v43  }

</bundles_post_ra>
